<compile_context>
chip_gen: v7x
topology: tpu7x:2x2x1
jax: 0.10.0
libtpu: 0.0.40
codegen_flags: <defaults>
</compile_context>

<pallas_src>
import math

import jax
import jax.numpy as jnp
from jax import lax
from jax.experimental import pallas as pl
from jax.experimental.pallas import tpu as pltpu

_VMEM_PLAN_BUDGET = 40 * 1024 * 1024    # tile plan must fit this (v7x: 64 MiB physical)
_VMEM_LIMIT_CAP = 48 * 1024 * 1024      # scoped-VMEM request ceiling (headroom on v7x)


def _round_up(x, m):
    return ((x + m - 1) // m) * m


# ------------------------------- kernels ----------------------------------

def _kernel_whole_k(x_ref, w_ref, b_ref, o_ref):
    """One (tm, tn) output tile = x_block @ W_block^T + b_block, whole K resident."""
    acc = lax.dot_general(
        x_ref[...], w_ref[...],
        dimension_numbers=(((1,), (1,)), ((), ())),     # contract both last dims: x @ W^T
        preferred_element_type=jnp.float32,
    )
    o_ref[...] = (acc + b_ref[...].astype(jnp.float32)).astype(o_ref.dtype)


def _kernel_tiled_k_f32out(x_ref, w_ref, b_ref, o_ref):
    """Tiled-K fallback, f32 output: accumulate directly into the resident out block."""
    k = pl.program_id(2)
    nk = pl.num_programs(2)

    @pl.when(k == 0)
    def _():
        o_ref[...] = jnp.zeros_like(o_ref)

    o_ref[...] += lax.dot_general(
        x_ref[...], w_ref[...],
        dimension_numbers=(((1,), (1,)), ((), ())),
        preferred_element_type=jnp.float32,
    )

    @pl.when(k == nk - 1)
    def _():
        o_ref[...] += b_ref[...].astype(jnp.float32)


def _kernel_tiled_k_acc(x_ref, w_ref, b_ref, o_ref, acc_ref):
    """Tiled-K fallback for sub-f32 outputs: f32 scratch accumulator."""
    k = pl.program_id(2)
    nk = pl.num_programs(2)

    @pl.when(k == 0)
    def _():
        acc_ref[...] = jnp.zeros_like(acc_ref)

    acc_ref[...] += lax.dot_general(
        x_ref[...], w_ref[...],
        dimension_numbers=(((1,), (1,)), ((), ())),
        preferred_element_type=jnp.float32,
    )

    @pl.when(k == nk - 1)
    def _():
        o_ref[...] = (acc_ref[...] + b_ref[...].astype(jnp.float32)).astype(o_ref.dtype)


# ------------------------------- wrapper -----------------------------------

def prepare_imputation_params(W, b=None, *, compute_dtype=None):
    """One-time parameter prep (call once, reuse across forward calls):
    fold the (1 - eye) mask into W, zero-pad features to a lane-dense multiple
    of 128, optionally cast W to a lower MXU dtype (e.g. jnp.bfloat16)."""
    d_in = W.shape[0]
    assert W.shape == (d_in, d_in), "W must be square (d_in, d_in)"
    dp = _round_up(d_in, 128)

    Wm = W * (1.0 - jnp.eye(d_in, dtype=W.dtype))        # diagonal masked once, wrapper-side
    if dp != d_in:
        Wm = jnp.pad(Wm, ((0, dp - d_in), (0, dp - d_in)))
    if compute_dtype is not None:
        Wm = Wm.astype(compute_dtype)

    if b is None:
        bp = jnp.zeros((1, dp), dtype=jnp.float32)
    else:
        bf = b.astype(jnp.float32)
        if dp != d_in:
            bf = jnp.pad(bf, (0, dp - d_in))
        bp = bf.reshape(1, dp)

    return dict(W=Wm, b=bp, d_in=d_in, dp=dp, compute_dtype=compute_dtype)


def imputation_apply(x, params, *, _force_tiled_k=False):
    """y = x @ ((1-eye)*W)^T + b using prepared params.  x: (..., d_in)."""
    Wm, bp = params["W"], params["b"]
    d_in, dp = params["d_in"], params["dp"]
    assert x.shape[-1] == d_in

    lead = x.shape[:-1]
    m = int(math.prod(lead)) if lead else 1
    out_dtype = x.dtype
    x2d = x.reshape(m, d_in)
    if x2d.dtype != Wm.dtype:                 # bf16 opt-in (or dtype alignment)
        x2d = x2d.astype(Wm.dtype)

    xb = jnp.dtype(x2d.dtype).itemsize
    wb = jnp.dtype(Wm.dtype).itemsize
    ob = jnp.dtype(out_dtype).itemsize

    # N (and K, for the fallback) tile: 256 only when it divides dp (v6e/v7x 256^2 MXU),
    # else 128 (native on v5e; avoids padding d e.g. 384 -> 512).
    tn = 256 if dp % 256 == 0 else 128
    assert dp % tn == 0

    # Adaptive M tile: largest power-of-two tile whose row padding stays <= ~25%.
    m8 = _round_up(m, 8)
    tm = 8
    for t in (1024, 512, 256, 128, 64, 32, 16, 8):
        if _round_up(m8, t) - m8 <= max(m8 // 4, 8):
            tm = t
            break
    # v7x has 2 TensorCores: if the N axis has only one block, keep >= 2 M blocks.
    if dp // tn < 2:
        while tm > 8 and _round_up(m8, tm) // tm < 2:
            tm //= 2

    # VMEM plan (BlockSpec double-buffers every operand / output tile).
    def whole_k_bytes(tm_):
        return 2 * tm_ * dp * xb + 2 * tn * dp * wb + 2 * tm_ * tn * ob + 2 * dp * 4

    use_whole_k = (not _force_tiled_k) and whole_k_bytes(8) <= _VMEM_PLAN_BUDGET
    if use_whole_k:
        while tm > 8 and whole_k_bytes(tm) > _VMEM_PLAN_BUDGET:
            tm //= 2
        footprint = whole_k_bytes(tm)
    else:
        tk = tn

        def tiled_k_bytes(tm_):
            return (2 * tm_ * tk * xb + 2 * tn * tk * wb + 2 * tm_ * tn * ob
                    + tm_ * tn * 4 + 2 * dp * 4)

        while tm > 8 and tiled_k_bytes(tm) > _VMEM_PLAN_BUDGET:
            tm //= 2
        footprint = tiled_k_bytes(tm)

    vmem_limit = max(min(int(footprint * 1.5) + (2 << 20), _VMEM_LIMIT_CAP), 16 << 20)

    # Pad only when required (zeros => numerically exact; K pad cols of W are zero).
    mp = _round_up(m, tm)
    pad_m, pad_k = mp - m, dp - d_in
    if pad_m or pad_k:
        x2d = jnp.pad(x2d, ((0, pad_m), (0, pad_k)))

    ni, nj = mp // tm, dp // tn

    if use_whole_k:
        out2d = pl.pallas_call(
            _kernel_whole_k,
            out_shape=jax.ShapeDtypeStruct((mp, dp), out_dtype),
            grid_spec=pltpu.PrefetchScalarGridSpec(
                num_scalar_prefetch=0,
                grid=(ni, nj),
                in_specs=[
                    pl.BlockSpec((tm, dp), lambda i, j: (i, 0)),   # x row block, whole K
                    pl.BlockSpec((tn, dp), lambda i, j: (j, 0)),   # W (out, in) layout, whole K
                    pl.BlockSpec((1, tn), lambda i, j: (0, j)),    # bias slice
                ],
                out_specs=pl.BlockSpec((tm, tn), lambda i, j: (i, j)),
            ),
            compiler_params=pltpu.CompilerParams(
                dimension_semantics=("parallel", "parallel"),
                vmem_limit_bytes=vmem_limit,
            ),
        )(x2d, Wm, bp)
    else:
        nk = dp // tk
        f32_out = out_dtype == jnp.float32
        kernel = _kernel_tiled_k_f32out if f32_out else _kernel_tiled_k_acc
        scratch = [] if f32_out else [pltpu.VMEM((tm, tn), jnp.float32)]
        out2d = pl.pallas_call(
            kernel,
            out_shape=jax.ShapeDtypeStruct((mp, dp), out_dtype),
            grid_spec=pltpu.PrefetchScalarGridSpec(
                num_scalar_prefetch=0,
                grid=(ni, nj, nk),
                in_specs=[
                    pl.BlockSpec((tm, tk), lambda i, j, k: (i, k)),
                    pl.BlockSpec((tn, tk), lambda i, j, k: (j, k)),
                    pl.BlockSpec((1, tn), lambda i, j, k: (0, j)),
                ],
                out_specs=pl.BlockSpec((tm, tn), lambda i, j, k: (i, j)),
                scratch_shapes=scratch,
            ),
            compiler_params=pltpu.CompilerParams(
                dimension_semantics=("parallel", "parallel", "arbitrary"),
                vmem_limit_bytes=vmem_limit,
            ),
        )(x2d, Wm, bp)

    out2d = out2d[:m, :d_in]
    return out2d.reshape(*lead, d_in)


def imputation_layer(x, W, b=None, *, compute_dtype=None):
    """Convenience wrapper: F.linear(x, (1-eye(d))*W, b).  Prefer preparing
    params once with prepare_imputation_params() for repeated calls."""
    return imputation_apply(x, prepare_imputation_params(W, b, compute_dtype=compute_dtype))


def init_params(key, d_in, bias=True, dtype=jnp.float32):
    """Deterministic init mirroring the PyTorch module's reset_parameters."""
    kw, kb = jax.random.split(key)
    # kaiming_uniform_(a=sqrt(5)) on a (d_in, d_in) weight => bound = 1/sqrt(d_in)
    w_bound = 1.0 / math.sqrt(d_in)
    W = jax.random.uniform(kw, (d_in, d_in), dtype, -w_bound, w_bound)
    if bias:
        b_bound = 1.0 / math.sqrt(d_in)
        b = jax.random.uniform(kb, (d_in,), dtype, -b_bound, b_bound)
    else:
        b = None
    return W, b


if __name__ == "__main__":
    key = jax.random.PRNGKey(0)
    k_x, k_p, k_x2, k_p2 = jax.random.split(key, 4)

    # Small shape consistent with the module's forward: (batch, seq, d_in).
    batch, seq, d_in = 2, 8, 32
    x = jax.random.normal(k_x, (batch, seq, d_in), dtype=jnp.float32)
    W, b = init_params(k_p, d_in, bias=True)
    params = prepare_imputation_params(W, b)

    out = jax.block_until_ready(imputation_apply(x, params))
    mask = 1.0 - jnp.eye(d_in, dtype=jnp.float32)
    ref = x @ (mask * W).T + b
    assert out.shape == (batch, seq, d_in)
    assert jnp.allclose(out, ref, atol=1e-5, rtol=1e-5)

    # Larger shape: multi-tile (ni, nj) grid on the whole-K path.
    batch2, seq2, d_in2 = 4, 96, 384
    x2 = jax.random.normal(k_x2, (batch2, seq2, d_in2), dtype=jnp.float32)
    W2, b2 = init_params(k_p2, d_in2, bias=True)
    params2 = prepare_imputation_params(W2, b2)
    ref2 = x2 @ ((1.0 - jnp.eye(d_in2)) * W2).T + b2

    out2 = jax.block_until_ready(imputation_apply(x2, params2))
    assert out2.shape == (batch2, seq2, d_in2)
    assert jnp.allclose(out2, ref2, atol=1e-3, rtol=1e-3)

    # Exercise the tiled-K fallback (used when W is too large to keep K-resident).
    out2_tk = jax.block_until_ready(imputation_apply(x2, params2, _force_tiled_k=True))
    assert jnp.allclose(out2_tk, ref2, atol=1e-3, rtol=1e-3)

    # Opt-in bf16-operand / f32-accumulate path (changes numerics vs. f32 module).
    params2_bf16 = prepare_imputation_params(W2, b2, compute_dtype=jnp.bfloat16)
    out2_bf16 = jax.block_until_ready(imputation_apply(x2, params2_bf16))
    assert out2_bf16.dtype == x2.dtype
    assert jnp.allclose(out2_bf16, ref2, atol=5e-2, rtol=5e-2)

    # bf16 inputs through the tiled-K fallback (covers the scratch-accumulator kernel).
    out2_bf16_tk = jax.block_until_ready(
        imputation_apply(x2.astype(jnp.bfloat16), params2_bf16, _force_tiled_k=True))
    assert out2_bf16_tk.dtype == jnp.bfloat16
    assert jnp.allclose(out2_bf16_tk.astype(jnp.float32), ref2, atol=1e-1, rtol=1e-1)

    print("KERNEL_OK")
</pallas_src>

<mosaic_0001>
module attributes {stable_mosaic.version = 11 : i64} {
  func.func @_kernel_whole_k(%arg0: i32, %arg1: i32, %arg2: memref<8x128xf32, #tpu.memory_space<vmem>>, %arg3: memref<128x128xf32, #tpu.memory_space<vmem>>, %arg4: memref<1x128xf32, #tpu.memory_space<vmem>>, %arg5: memref<8x128xf32, #tpu.memory_space<vmem>>) attributes {dimension_semantics = [#tpu.dimension_semantics<parallel>, #tpu.dimension_semantics<parallel>], iteration_bounds = array<i64: 2, 1>, scalar_prefetch = 0 : i64, scratch_operands = 0 : i64, tpu.core_type = #tpu.core_type<tc>, window_params = [{transform_indices = @transform_0, window_bounds = array<i64: 8, 128>}, {transform_indices = @transform_1, window_bounds = array<i64: 128, 128>}, {transform_indices = @transform_2, window_bounds = array<i64: 1, 128>}, {transform_indices = @transform_3, window_bounds = array<i64: 8, 128>}]} {
    %c0 = arith.constant 0 : index
    %c0_0 = arith.constant 0 : index
    %0 = vector.load %arg2[%c0, %c0_0] : memref<8x128xf32, #tpu.memory_space<vmem>>, vector<8x128xf32>
    %c0_1 = arith.constant 0 : index
    %c0_2 = arith.constant 0 : index
    %1 = vector.load %arg3[%c0_1, %c0_2] : memref<128x128xf32, #tpu.memory_space<vmem>>, vector<128x128xf32>
    %cst = arith.constant dense<0.000000e+00> : vector<8x128xf32>
    %2 = tpu.matmul %0, %1, %cst {dimension_numbers = #tpu.dot_dimension_numbers<[1], [1], [0], [0], [0, 0, 1, 0], [], []>} : vector<8x128xf32>, vector<128x128xf32>, vector<8x128xf32> -> vector<8x128xf32>
    %c0_3 = arith.constant 0 : index
    %c0_4 = arith.constant 0 : index
    %3 = vector.load %arg4[%c0_3, %c0_4] : memref<1x128xf32, #tpu.memory_space<vmem>>, vector<1x128xf32>
    %4 = vector.broadcast %3 : vector<1x128xf32> to vector<8x128xf32>
    %5 = arith.addf %2, %4 : vector<8x128xf32>
    %c0_5 = arith.constant 0 : index
    %c0_6 = arith.constant 0 : index
    %6 = vector.load %arg5[%c0_5, %c0_6] : memref<8x128xf32, #tpu.memory_space<vmem>>, vector<8x128xf32>
    tpu.vector_store %arg5[%c0_5, %c0_6], %5 {strides = array<i32>} : memref<8x128xf32, #tpu.memory_space<vmem>>, vector<8x128xf32>,
    return
  }
  func.func @transform_0(%arg0: i32, %arg1: i32) -> (i32, i32) {
    %c0_i32 = arith.constant 0 : i32
    %c0_i32_0 = arith.constant 0 : i32
    return %arg0, %c0_i32 : i32, i32
  }
  func.func @transform_1(%arg0: i32, %arg1: i32) -> (i32, i32) {
    %c0_i32 = arith.constant 0 : i32
    %c0_i32_0 = arith.constant 0 : i32
    return %arg1, %c0_i32 : i32, i32
  }
  func.func @transform_2(%arg0: i32, %arg1: i32) -> (i32, i32) {
    %c0_i32 = arith.constant 0 : i32
    %c0_i32_0 = arith.constant 0 : i32
    return %c0_i32, %arg1 : i32, i32
  }
  func.func @transform_3(%arg0: i32, %arg1: i32) -> (i32, i32) {
    %c0_i32 = arith.constant 0 : i32
    return %arg0, %arg1 : i32, i32
  }
}

</mosaic_0001>

<bundles_post_ra>
// kernel: tpu_custom_call.1
= control target key start
LH: loop header
LB: loop body
LE: loop exit
PB: predicated region body
PF: predicated region fallthrough
CT: control target
= control target key end

     0   :  { %8 = vsyncpa [#allocation3], 0  ;;  %s1020_s0 = inlined_call_operand.hbm [shape: f32[16,128], index: 0, kind: input, shape index: {}]   ;;  %s1021_s1 = inlined_call_operand.hbm [shape: f32[128,128], index: 1, kind: input, shape index: {}]   ;;  %s1022_s2 = inlined_call_operand.vmem [shape: f32[1,128], index: 2, kind: input, shape index: {}]   ;;  %s1023_s3 = inlined_call_operand.hbm [shape: f32[16,128], index: 3, kind: output, shape index: {}]  }
   0x1   :  { %10 = vsyncpa [#allocation3 + $0x1], 0 }
   0x2   :  { %11 = vsyncpa [#allocation6], 0 }
   0x3   :  { %12 = vsyncpa [#allocation4], 0 }
   0x4   :  { %14 = vsyncpa [#allocation4 + $0x1], 0  ;;  %s796_s12 = smov 0   ;;  %s798_s13 = smov 0  }
   0x5   :  { %s800_s14 = smov 0   ;;  %s802_s15 = smov 0  }
   0x6   :  { %s804_s16 = smov 0   ;;  %s806_s17 = smov 0  }
   0x7 LB: > { %s451_s18 = sadd.s32 4294967295, %s766_s17   ;;  %s452_s19 = sadd.s32 4294967294, %s766_s17   ;;  %s766_s17 = sphi %s806_s17, %s20_s17   ;;  %s762_s16 = sphi %s804_s16, %s1047_s16   ;;  %s758_s15 = sphi %s802_s15, %s1046_s15   ;;  %s754_s14 = sphi %s800_s14, %s1045_s14   ;;  %s750_s13 = sphi %s798_s13, %s1044_s13   ;;  %s746_s12 = sphi %s796_s12, %s1043_s12  }
   0x8   : > { %p52_p0 = scmp.ne.s32.totalorder %s750_s13, %s746_s12  ;;  %p830_p1 = scmp.eq.s32.totalorder %s451_s18, 0 }
   0x9   : > { %p834_p2 = scmp.eq.s32.totalorder %s451_s18, 1  ;;  %p136_p3 = scmp.eq.s32.totalorder %s452_s19, 1 }
   0xa   : > { %s1028_s20 = scalar_select %p830_p1, 1, 0 }
   0xb   : > { %s1029_s21 = scalar_select %p834_p2, 1, 0 }
   0xc   : > { %p840_p4 = por %p830_p1, %p52_p0  ;;  %p453_p5 = scmp.ge.s32.totalorder %s766_s17, 1 }
   0xd   : > { %p845_p6 = por %p136_p3, %p52_p0  ;;  %p143_p7 = scmp.lt.s32.totalorder %s766_s17, 3 }
   0xe   : > { %s1030_s22 = scalar_select %p840_p4, 1, 0 }
   0xf   : > { %s1031_s23 = scalar_select %p845_p6, 1, 0 }
  0x10   : > { %p850_p8 = pnand %p453_p5, %p143_p7  ;;  %s768_s25 = smov [#allocation5]  }
  0x11   : > { %s158_s26 = sshll.u32 %s768_s25, 4  ;;  %s32_s28 = sadd.s32 1, %s762_s16  ;;  %s159_s26 = int_to_ptr.vmem [resolvable:$true] %s158_s26 }
  0x12   : > { %s1032_s24 = scalar_select %p850_p8, 1, 0 }
  0x13   : > { %p552_p9 = pneg %p850_p8  ;;  %s622_s4 = scalar_lea.hbm %s1021_s1, 2048 }
  0x14   : > { %p623_p12 = scmp.ne.s32.totalorder %s1021_s1, %s622_s4  ;;  %p629_p5 = scmp.lt.u32.totalorder %s622_s4, %s1021_s1 }
  0x15   : > { %p859_p11 = pnand %p552_p9, %p830_p1 }
  0x17   : > { %p624_p13 = pneg %p859_p11 }
  0x19   : > { %p625_p0 = pnand %p624_p13, %p623_p12 }
  0x1b   : > { %p626_p3 = pneg %p625_p0 }
  0x1d   : > { %p631_p7 = pnand %p629_p5, %p626_p3 }
  0x1f   : > { %634 = shalt.err (!%p631_p7)
}
  0x20   : > { %s635_s9 = scalar_lea.vmem %s159_s26, 2048  ;;  %p643_p1 = scmp.lt.s32.totalorder %s159_s26, %s159_s26 }
  0x21   : > { %p636_p9 = scmp.ne.s32.totalorder %s159_s26, %s635_s9  ;;  %p644_p4 = scmp.lt.s32.totalorder %s635_s9, %s635_s9 }
  0x23   : > { %p638_p10 = pnand %p636_p9, %p624_p13  ;;  %p645_p8 = por %p644_p4, %p643_p1 }
  0x25   : > { %p639_p6 = pneg %p638_p10 }
  0x27   : > { %p646_p2 = pnand %p645_p8, %p639_p6 }
  0x29   : > { %649 = shalt.err (!%p646_p2)
}
  0x2a   : > { %s769_s10 = smov 128   ;;  %s770_s11 = smov 8  }
  0x2b   : > { %555 = dma.hbm_to_vmem [thread:$0]  (!%p859_p11), %s1021_s1, 2048, %s159_s26, [#allocation6], %s769_s10, %s769_s10, %s770_s11  }
  0x2c   : > { %p34_p1 = scmp.ge.s32.totalorder %s32_s28, 2  ;;  %s39_s25 = sadd.s32 1, %s754_s14 }
  0x2d   : > { %p46_p2 = scmp.ne.s32.totalorder %s754_s14, %s750_s13  ;;  %p47_p4 = scmp.eq.s32.totalorder %s766_s17, 0 }
  0x2e   : > { %s1049_s28 = smov (%p34_p1, %s32_s28), 0  ;;  %p1035_p8 = scmp.ne.s32.totalorder %s1029_s21, 0 }
  0x2f   : > { %p886_p6 = por %p47_p4, %p46_p2  ;;  %s36_s27 = ssub.s32 %s762_s16, %s1049_s28 }
  0x30   : > { %p892_p10 = por %p1035_p8, %p46_p2  ;;  %p565_p12 = scmp.lt.s32.totalorder %s766_s17, 2 }
  0x31   : > { %p37_p11 = scmp.eq.s32.totalorder %s36_s27, 0  ;;  %s178_s26 = sand.u32 1, %s754_s14  }
  0x32   : > { %s457_s4 = sshll.u32 %s178_s26, 3  ;;  %s458_s6 = sshll.u32 %s762_s16, 7 }
  0x33   : > { %s901_s5 = scalar_select %p37_p11, %s754_s14, %s39_s25  }
  0x34   : > { %s907_s9 = scalar_lea.hbm %s1020_s0, %s458_s6  ;;  %s182_s21 = scalar_lea.vmem [#allocation2], %s457_s4 }
  0x35   : > { %s189_s10 = sshll.u32 %s182_s21, 4  ;;  %p913_p13 = pnand %p565_p12, %p886_p6  ;;  %s909_s10 = int_to_ptr.vmem [resolvable:$true] %s189_s10 }
  0x36   : > { %s179_s18 = scalar_lea.sflag [#allocation3], %s178_s26  ;;  %s650_s19 = scalar_lea.hbm %s907_s9, 128 }
  0x37   : > { %p651_p0 = scmp.ne.s32.totalorder %s907_s9, %s650_s19  ;;  %p652_p3 = pneg %p913_p13 }
  0x38   : > { %s655_s4 = scalar_lea.hbm %s1020_s0, 256  ;;  %p656_p9 = scmp.lt.u32.totalorder %s907_s9, %s1020_s0 }
  0x39   : > { %p653_p5 = pnand %p652_p3, %p651_p0  ;;  %p657_p1 = scmp.lt.u32.totalorder %s655_s4, %s650_s19 }
  0x3a   : > { %p659_p4 = scmp.lt.u32.totalorder %s650_s19, %s907_s9 }
  0x3b   : > { %p654_p7 = pneg %p653_p5  ;;  %p658_p2 = por %p657_p1, %p656_p9 }
  0x3d   : > { %p660_p6 = por %p659_p4, %p658_p2 }
  0x3f   : > { %p661_p8 = pnand %p660_p6, %p654_p7 }
  0x41   : > { %664 = shalt.err (!%p661_p8)
}
  0x42   : > { %s665_s26 = scalar_lea.vmem %s909_s10, 128  ;;  %s771_s7 = smov [#allocation2]  }
  0x43   : > { %p666_p12 = scmp.ne.s32.totalorder %s909_s10, %s665_s26  ;;  %s670_s8 = sshll.u32 %s771_s7, 4  ;;  %s671_s8 = int_to_ptr.vmem [resolvable:$false] %s670_s8 }
  0x44   : > { %s672_s21 = scalar_lea.vmem %s671_s8, 256  ;;  %p673_p5 = scmp.lt.s32.totalorder %s909_s10, %s671_s8 }
  0x45   : > { %p668_p11 = pnand %p666_p12, %p652_p3  ;;  %p674_p9 = scmp.lt.s32.totalorder %s672_s21, %s665_s26 }
  0x47   : > { %p669_p0 = pneg %p668_p11  ;;  %p675_p1 = por %p674_p9, %p673_p5 }
  0x49   : > { %p676_p2 = pnand %p675_p1, %p669_p0 }
  0x4b   : > { %679 = shalt.err (!%p676_p2)
}
  0x4c   : > { %559 = dma.hbm_to_vmem [thread:$0]  (!%p913_p13), %s907_s9, 128, %s909_s10, %s179_s18  }
  0x4d   : > { %p1038_p7 = scmp.ne.s32.totalorder %s1032_s24, 0 }
  0x4e   : > { %s945_s19 = sand.u32 (!%p1038_p7), 1, %s750_s13   ;;  %p1039_p3 = scmp.ne.s32.totalorder (!%p1038_p7), %s1030_s22, 0 }
  0x4f   : > { %198 = sbr.rel (%p1038_p7) target bundleno = 385 (0x181), region = 32  ;;  %s460_s25 = sshll.u32 (!%p1038_p7), %s945_s19, 3 }
  0x50   : > { %s201_s27 = scalar_lea.sflag (!%p1038_p7), [#allocation3], %s945_s19  ;;  %s951_s4 = scalar_lea.vmem (!%p1038_p7), [#allocation2], %s460_s25 }
  0x56   : > { %733 = dma.done.wait (%p1039_p3), %s201_s27, 128  }
  0x57   : > { %735 = vsyncadd (%p1039_p3), %s201_s27, 4294967168  ;;  %p1040_p13 = scmp.ne.s32.totalorder %s1028_s20, 0 }
  0x59   : > { %737 = dma.done.wait (%p1040_p13), [#allocation6], 2048  }
  0x5a   : > { %739 = vsyncadd (%p1040_p13), [#allocation6], 4294965248  ;;  %v772_v0 = vmov 0.0|0.0   ;;  %vm773_vm0 = vmmov 0   ;;  %v774_v1 = vmov 0.0   ;;  %v239_v2 = vld [vmem:[#allocation5] sm:$0xff] }
  0x5b   : > { %520 = vmatprep.subr.bf16.mxu0 %v772_v0  ;;  %517 = vmatprep.mubr.msk.f32.mxu0 %vm773_vm0, %v774_v1  ;;  %v240_v3 = vld [vmem:[#allocation5 + $0x8] sm:$0xff]  ;;  %v241_v5 = vld [vmem:[#allocation5 + $0x10] sm:$0xff]  ;;  %v242_v6 = vld [vmem:[#allocation5 + $0x18] sm:$0xff]  ;;  %s465_s24 = sshll.u32 %s758_s15, 7  ;;  %s233_s9 = scalar_lea.vmem [#allocation7], %s460_s25 }
  0x5c   : > { %v521_v4 = vpack.c.bf16 %v240_v3, %v239_v2  ;;  %v524_v7 = vpack.c.bf16 %v242_v6, %v241_v5  ;;  %v243_v8 = vld [vmem:[#allocation5 + $0x20] sm:$0xff]  ;;  %v244_v9 = vld [vmem:[#allocation5 + $0x28] sm:$0xff]  ;;  %v245_v11 = vld [vmem:[#allocation5 + $0x30] sm:$0xff]  ;;  %s348_s10 = sshll.u32 %s233_s9, 4  ;;  %s971_s29 = scalar_lea.hbm %s1023_s3, %s465_s24  ;;  %s973_s10 = int_to_ptr.vmem [resolvable:$true] %s348_s10 }
  0x5d   : > { %v527_v10 = vpack.c.bf16 %v244_v9, %v243_v8  ;;  %v246_v12 = vld [vmem:[#allocation5 + $0x38] sm:$0xff]  ;;  %v247_v14 = vld [vmem:[#allocation5 + $0x40] sm:$0xff]  ;;  %v248_v15 = vld [vmem:[#allocation5 + $0x48] sm:$0xff]  ;;  %s334_s6 = scalar_lea.sflag [#allocation4], %s945_s19  ;;  %s680_s26 = scalar_lea.vmem %s973_s10, 128 }
  0x5e   : > { %522 = vmatpush3.bf16.xpose.msra.mxu0 %v521_v4  ;;  %v530_v13 = vpack.c.bf16 %v246_v12, %v245_v11  ;;  %v533_v16 = vpack.c.bf16 %v248_v15, %v247_v14  ;;  %v249_v17 = vld [vmem:[#allocation5 + $0x50] sm:$0xff]  ;;  %v250_v18 = vld [vmem:[#allocation5 + $0x58] sm:$0xff]  ;;  %v251_v20 = vld [vmem:[#allocation5 + $0x60] sm:$0xff]  ;;  %p681_p4 = scmp.ne.s32.totalorder %s973_s10, %s680_s26  ;;  %s775_s15 = smov [#allocation7]  }
  0x5f   : > { %523 = vmatprep.subr.bf16.mxu0 %v772_v0  ;;  %v536_v19 = vpack.c.bf16 %v250_v18, %v249_v17  ;;  %v252_v21 = vld [vmem:[#allocation5 + $0x68] sm:$0xff]  ;;  %v253_v23 = vld [vmem:[#allocation5 + $0x70] sm:$0xff]  ;;  %v254_v24 = vld [vmem:[#allocation5 + $0x78] sm:$0xff]  ;;  %s684_s7 = sshll.u32 %s775_s15, 4  ;;  %s685_s7 = int_to_ptr.vmem [resolvable:$false] %s684_s7 }
  0x60   : > { %v539_v22 = vpack.c.bf16 %v252_v21, %v251_v20  ;;  %v542_v25 = vpack.c.bf16 %v254_v24, %v253_v23  ;;  %v238_v26 = vld [vmem:[%s951_s4] sm:$0xff]  ;;  %p682_p6 = pnand %p681_p4, %p892_p10  ;;  %s686_s8 = scalar_lea.vmem %s685_s7, 256 }
  0x61   : > { %v463_v27 = vld [vmem:[%s1022_s2] ss:$0 sm:$0xff]  ;;  %p687_p12 = scmp.lt.s32.totalorder %s973_s10, %s685_s7  ;;  %p688_p11 = scmp.lt.s32.totalorder %s686_s8, %s680_s26 }
  0x62   : > { %p683_p8 = pneg %p682_p6 }
  0x63   : > { %p689_p0 = por %p688_p11, %p687_p12 }
  0x65   : > { %p690_p5 = pnand %p689_p0, %p683_p8 }
  0x66   : > { %525 = vmatpush3.bf16.xpose.msra.mxu0 %v524_v7 }
  0x67   : > { %526 = vmatprep.subr.bf16.mxu0 %v772_v0 }
  0x6e   : > { %528 = vmatpush3.bf16.xpose.msra.mxu0 %v527_v10 }
  0x6f   : > { %529 = vmatprep.subr.bf16.mxu0 %v772_v0 }
  0x76   : > { %531 = vmatpush3.bf16.xpose.msra.mxu0 %v530_v13 }
  0x77   : > { %532 = vmatprep.subr.bf16.mxu0 %v772_v0 }
  0x7e   : > { %534 = vmatpush3.bf16.xpose.msra.mxu0 %v533_v16 }
  0x7f   : > { %535 = vmatprep.subr.bf16.mxu0 %v772_v0 }
  0x86   : > { %537 = vmatpush3.bf16.xpose.msra.mxu0 %v536_v19 }
  0x87   : > { %538 = vmatprep.subr.bf16.mxu0 %v772_v0 }
  0x8e   : > { %540 = vmatpush3.bf16.xpose.msra.mxu0 %v539_v22 }
  0x8f   : > { %541 = vmatprep.subr.bf16.mxu0 %v772_v0 }
  0x96   : > { %543 = vmatpush3.bf16.xpose.msra.mxu0 %v542_v25 }
  0x9d   : > { %518 = vmatmul.mubr.f32.vlgmr.msra.gmra.mrb[0].mxu0 %v238_v26 }
 0x170   : > { %v328_v28 = vpop.f32.mrb[0].mxu0 }
 0x171   : > { %v329_v29 = vadd.f32 %v463_v27, %v328_v28  ;;  %v519_v30 = vpop.f32.mrb[1].mxu0 }
 0x173   : > { %332 = vst [vmem:[%s233_s9] sm:$0xff] %v329_v29 }
 0x174   : > { %693 = shalt.err (!%p690_p5)
}
 0x175   : > { %s694_s21 = scalar_lea.hbm %s971_s29, 128  ;;  %s698_s27 = scalar_lea.hbm %s1023_s3, 256 }
 0x176   : > { %p695_p9 = scmp.ne.s32.totalorder %s971_s29, %s694_s21  ;;  %p699_p7 = scmp.lt.u32.totalorder %s971_s29, %s1023_s3 }
 0x177   : > { %p700_p3 = scmp.lt.u32.totalorder %s698_s27, %s694_s21  ;;  %p702_p4 = scmp.lt.u32.totalorder %s694_s21, %s971_s29 }
 0x178   : > { %p696_p1 = pnand %p695_p9, %p892_p10 }
 0x179   : > { %p701_p13 = por %p700_p3, %p699_p7 }
 0x17a   : > { %p697_p2 = pneg %p696_p1 }
 0x17b   : > { %p703_p6 = por %p702_p4, %p701_p13 }
 0x17d   : > { %p704_p8 = pnand %p703_p6, %p697_p2 }
 0x17f   : > { %707 = shalt.err (!%p704_p8)
}
 0x180   : > { %550 = dma.vmem_to_hbm [thread:$0]  (%p892_p10), %s973_s10, 128, %s971_s29, %s334_s6  }
 0x181 PF: > { %s360_s22 = sand.u32 1, %s746_s12   ;;  %p1041_p12 = scmp.ne.s32.totalorder %s1031_s23, 0 }
 0x182   : > { %p1042_p11 = scmp.ge.s32.totalorder %s766_s17, 2  ;;  %s361_s24 = scalar_lea.sflag [#allocation4], %s360_s22 }
 0x184   : > { %p561_p0 = pnand %p1042_p11, %p1041_p12 }
 0x186   : > { %741 = dma.done.wait (!%p561_p0), %s361_s24, 128  }
 0x187   : > { %743 = vsyncadd (!%p561_p0), %s361_s24, 4294967168  ;;  %s20_s17 = sadd.s32 1, %s766_s17   ;;  %s1043_s12 = smov %s750_s13 }
 0x188   : > { %p17_p5 = scmp.ge.s32.totalorder %s20_s17, 4   ;;  %s1044_s13 = smov %s754_s14 }
 0x189   : > { %s1045_s14 = smov %s901_s5  ;;  %s1046_s15 = smov %s762_s16 }
 0x18a   : > { %s1047_s16 = smov %s1049_s28  ;;  %19 = sbr.rel (!%p17_p5) target bundleno = 7 (0x7), region = 85 }
 0x191   :  { %366 = vsyncpa [#allocation3], 1 }
 0x192   :  { %368 = vsyncpa [#allocation3 + $0x1], 1 }
 0x193   :  { %369 = vsyncpa [#allocation6], 1 }
 0x194   :  { %370 = vsyncpa [#allocation4], 1 }
 0x195   :  { %372 = vsyncpa [#allocation4 + $0x1], 1 }

</bundles_post_ra>
